<compile_context>
chip_gen: v6e
topology: v6e:2x2x1
jax: 0.10.0
libtpu: 0.0.40
codegen_flags: <defaults>
</compile_context>

<pallas_src>
import functools

import jax
import jax.numpy as jnp
from jax import lax
from jax.experimental import pallas as pl
from jax.experimental.pallas import tpu as pltpu


# ----------------------------------------------------------------------------
# Kernel
# ----------------------------------------------------------------------------
def bottleneck_kernel(x_ref, w1_ref, b1_ref, w2_ref, b2_ref, w3_ref, b3_ref,
                      mask_ref, o_ref, *, H, W):
    HW = H * W

    x = x_ref[0]                                   # (Cin, HW), spatial on lanes

    # --- conv1 (1x1, bn1 scale folded into w1) + bias + relu ----------------
    # (P, Cin) @ (Cin, HW) -> (P, HW): lane dim = HW (>=128), single MXU matmul
    h = jnp.dot(w1_ref[...], x, preferred_element_type=jnp.float32)
    h = jnp.maximum(h + b1_ref[...], 0.0)          # b1: (P, 1), lane-broadcast

    # --- conv2 (3x3, stride 1, pad 1, bn2 scale folded) + bias + relu -------
    # Build the 9 shifted taps with lane rotations (XLU slot) + precomputed
    # boundary masks, concatenate along sublanes and do ONE matmul with
    # K = 9*P instead of 9 tiny K=P matmuls.
    taps = []
    for ky in range(3):
        for kx in range(3):
            off = (ky - 1) * W + (kx - 1)          # flat spatial offset of tap
            if off == 0:
                taps.append(h)                     # center tap: no roll, no mask
            else:
                t = pltpu.roll(h, shift=(-off) % HW, axis=1)   # t[:, p] = h[:, p+off]
                m = mask_ref[ky * 3 + kx].reshape(1, HW)       # zero-padding mask
                taps.append(t * m)
    patches = jnp.concatenate(taps, axis=0)        # (9*P, HW)
    h2 = jnp.dot(w2_ref[...], patches, preferred_element_type=jnp.float32)
    h2 = jnp.maximum(h2 + b2_ref[...], 0.0)

    # --- conv3 (1x1, bn3 scale folded) + bias + residual + relu -------------
    out = jnp.dot(w3_ref[...], h2, preferred_element_type=jnp.float32)
    out = jnp.maximum(out + b3_ref[...] + x, 0.0)  # residual = x (no downsample)

    o_ref[0] = out.astype(o_ref.dtype)             # lane-dense (Cout, HW) store


# ----------------------------------------------------------------------------
# Param folding / mask precompute (host side)
# ----------------------------------------------------------------------------
def fold_params(params):
    """Fold eval-mode BN scales into conv weights; transpose for (C_out, K) dots."""
    w1, s1, b1, w2, s2, b2, w3, s3, b3 = params
    planes = w1.shape[1]
    cout = w3.shape[1]
    w1f = (w1 * s1).T                                            # (P, Cin)
    b1c = b1.reshape(planes, 1)
    w2f = (w2 * s2.reshape(1, 1, 1, -1)).reshape(9 * planes, planes).T  # (P, 9P)
    b2c = b2.reshape(planes, 1)
    w3f = (w3 * s3).T                                            # (Cout, P)
    b3c = b3.reshape(cout, 1)
    return w1f, b1c, w2f, b2c, w3f, b3c


def make_conv_masks(H, W):
    """(9, H*W) f32 masks implementing the zero-padding of the 3x3 conv taps."""
    y = jnp.arange(H)[:, None]
    x = jnp.arange(W)[None, :]
    masks = []
    for dy in (-1, 0, 1):
        for dx in (-1, 0, 1):
            valid = ((y + dy >= 0) & (y + dy < H) &
                     (x + dx >= 0) & (x + dx < W))
            masks.append(valid.astype(jnp.float32).reshape(H * W))
    return jnp.stack(masks, axis=0)


# ----------------------------------------------------------------------------
# Wrapper
# ----------------------------------------------------------------------------
def bottleneck_forward(x, params):
    """x: NCHW (N, Cin, H, W); params: raw (w1,s1,b1,w2,s2,b2,w3,s3,b3)."""
    N, Cin, H, W = x.shape
    HW = H * W

    w1f, b1c, w2f, b2c, w3f, b3c = fold_params(params)
    P = w1f.shape[0]
    Cout = w3f.shape[0]
    if Cin != Cout:
        raise ValueError("Bottleneck with downsample=None requires "
                         "inplanes == planes * expansion for the residual add.")
    masks = make_conv_masks(H, W)

    x_flat = x.reshape(N, Cin, HW)                 # layout plumbing in XLA

    kernel = functools.partial(bottleneck_kernel, H=H, W=W)

    flops = 2 * N * HW * (Cin * P + 9 * P * P + P * Cout)
    bytes_accessed = 4 * (x_flat.size + N * Cout * HW + w1f.size + w2f.size
                          + w3f.size + b1c.size + b2c.size + b3c.size
                          + masks.size)

    in_specs = [
        pl.BlockSpec((1, Cin, HW), lambda n: (n, 0, 0)),
        pl.BlockSpec(w1f.shape, lambda n: (0, 0)),
        pl.BlockSpec(b1c.shape, lambda n: (0, 0)),
        pl.BlockSpec(w2f.shape, lambda n: (0, 0)),
        pl.BlockSpec(b2c.shape, lambda n: (0, 0)),
        pl.BlockSpec(w3f.shape, lambda n: (0, 0)),
        pl.BlockSpec(b3c.shape, lambda n: (0, 0)),
        pl.BlockSpec(masks.shape, lambda n: (0, 0)),
    ]

    out_flat = pl.pallas_call(
        kernel,
        out_shape=jax.ShapeDtypeStruct((N, Cout, HW), x.dtype),
        grid_spec=pltpu.PrefetchScalarGridSpec(
            num_scalar_prefetch=0,
            grid=(N,),
            in_specs=in_specs,
            out_specs=pl.BlockSpec((1, Cout, HW), lambda n: (n, 0, 0)),
        ),
        compiler_params=pltpu.CompilerParams(
            dimension_semantics=("parallel",)),     # batch items independent (v7x 2 TCs)
        cost_estimate=pl.CostEstimate(flops=flops, transcendentals=0,
                                      bytes_accessed=bytes_accessed),
    )(x_flat, w1f, b1c, w2f, b2c, w3f, b3c, masks)

    return out_flat.reshape(N, Cout, H, W)


# ----------------------------------------------------------------------------
# Pure-JAX reference (NCHW, matches the PyTorch module)
# ----------------------------------------------------------------------------
def ref_forward(x, params):
    w1, s1, b1, w2, s2, b2, w3, s3, b3 = params

    def conv1x1(a, w):                             # w: (Cin, Cout)
        return jnp.einsum('nchw,cd->ndhw', a, w)

    def bn(a, s, b):                               # s, b: (1, C)
        return a * s[0, :, None, None] + b[0, :, None, None]

    h = jnp.maximum(bn(conv1x1(x, w1), s1, b1), 0.0)
    h = lax.conv_general_dilated(h, w2, window_strides=(1, 1), padding='SAME',
                                 dimension_numbers=('NCHW', 'HWIO', 'NCHW'))
    h = jnp.maximum(bn(h, s2, b2), 0.0)
    o = bn(conv1x1(h, w3), s3, b3)
    return jnp.maximum(o + x, 0.0)


def make_params(key, inplanes, planes, expansion=4):
    eps = 1e-5
    cout = planes * expansion
    ks = jax.random.split(key, 15)

    def bn_fold(kg, kb, km, kv, c):
        gamma = 0.5 + jax.random.uniform(kg, (1, c), jnp.float32)
        beta = 0.1 * jax.random.normal(kb, (1, c), jnp.float32)
        mean = 0.1 * jax.random.normal(km, (1, c), jnp.float32)
        var = 0.5 + jax.random.uniform(kv, (1, c), jnp.float32)
        scale = gamma / jnp.sqrt(var + eps)
        bias = beta - mean * scale
        return scale, bias

    w1 = 0.1 * jax.random.normal(ks[0], (inplanes, planes), jnp.float32)
    s1, b1 = bn_fold(ks[1], ks[2], ks[3], ks[4], planes)
    w2 = 0.1 * jax.random.normal(ks[5], (3, 3, planes, planes), jnp.float32)
    s2, b2 = bn_fold(ks[6], ks[7], ks[8], ks[9], planes)
    w3 = 0.1 * jax.random.normal(ks[10], (planes, cout), jnp.float32)
    s3, b3 = bn_fold(ks[11], ks[12], ks[13], ks[14], cout)
    return (w1, s1, b1, w2, s2, b2, w3, s3, b3)


if __name__ == "__main__":
    # Small shapes: batch=2, inplanes=32, planes=8 (expansion 4 => out=32), 16x16.
    N, H, W = 2, 16, 16
    planes, expansion = 8, 4
    inplanes = planes * expansion          # residual path needs matching channels

    key = jax.random.PRNGKey(0)
    kx, kp = jax.random.split(key)
    x = jax.random.normal(kx, (N, inplanes, H, W), jnp.float32)   # NCHW like PyTorch
    params = make_params(kp, inplanes, planes, expansion)

    out = bottleneck_forward(x, params)
    out = jax.block_until_ready(out)

    ref = jax.block_until_ready(ref_forward(x, params))
    assert out.shape == (N, planes * expansion, H, W)
    assert jnp.allclose(out, ref, rtol=1e-4, atol=1e-4), "mismatch vs JAX reference"

    print("KERNEL_OK")
</pallas_src>

<mosaic_0001>
module attributes {stable_mosaic.version = 11 : i64} {
  func.func @bottleneck_kernel(%arg0: i32, %arg1: memref<1x32x256xf32, #tpu.memory_space<vmem>>, %arg2: memref<8x32xf32, #tpu.memory_space<vmem>>, %arg3: memref<8x1xf32, #tpu.memory_space<vmem>>, %arg4: memref<8x72xf32, #tpu.memory_space<vmem>>, %arg5: memref<8x1xf32, #tpu.memory_space<vmem>>, %arg6: memref<32x8xf32, #tpu.memory_space<vmem>>, %arg7: memref<32x1xf32, #tpu.memory_space<vmem>>, %arg8: memref<9x256xf32, #tpu.memory_space<vmem>>, %arg9: memref<1x32x256xf32, #tpu.memory_space<vmem>>) attributes {dimension_semantics = [#tpu.dimension_semantics<parallel>], iteration_bounds = array<i64: 2>, scalar_prefetch = 0 : i64, scratch_operands = 0 : i64, tpu.core_type = #tpu.core_type<tc>, window_params = [{transform_indices = @transform_0, window_bounds = array<i64: 1, 32, 256>}, {pipeline_mode = #tpu.pipeline_mode<synchronous>, transform_indices = @transform_1, window_bounds = array<i64: 8, 32>}, {pipeline_mode = #tpu.pipeline_mode<synchronous>, transform_indices = @transform_2, window_bounds = array<i64: 8, 1>}, {pipeline_mode = #tpu.pipeline_mode<synchronous>, transform_indices = @transform_3, window_bounds = array<i64: 8, 72>}, {pipeline_mode = #tpu.pipeline_mode<synchronous>, transform_indices = @transform_4, window_bounds = array<i64: 8, 1>}, {pipeline_mode = #tpu.pipeline_mode<synchronous>, transform_indices = @transform_5, window_bounds = array<i64: 32, 8>}, {pipeline_mode = #tpu.pipeline_mode<synchronous>, transform_indices = @transform_6, window_bounds = array<i64: 32, 1>}, {pipeline_mode = #tpu.pipeline_mode<synchronous>, transform_indices = @transform_7, window_bounds = array<i64: 9, 256>}, {transform_indices = @transform_8, window_bounds = array<i64: 1, 32, 256>}]} {
    %c0 = arith.constant 0 : index
    %c0_0 = arith.constant 0 : index
    %c0_1 = arith.constant 0 : index
    %0 = vector.load %arg1[%c0, %c0_0, %c0_1] : memref<1x32x256xf32, #tpu.memory_space<vmem>>, vector<1x32x256xf32>
    %1 = vector.shape_cast %0 : vector<1x32x256xf32> to vector<32x256xf32>
    %c0_2 = arith.constant 0 : index
    %c0_3 = arith.constant 0 : index
    %2 = vector.load %arg2[%c0_2, %c0_3] : memref<8x32xf32, #tpu.memory_space<vmem>>, vector<8x32xf32>
    %cst = arith.constant dense<0.000000e+00> : vector<8x256xf32>
    %3 = tpu.matmul %2, %1, %cst {dimension_numbers = #tpu.dot_dimension_numbers<[1], [0], [0], [1], [0, 0, 1, 1], [], []>} : vector<8x32xf32>, vector<32x256xf32>, vector<8x256xf32> -> vector<8x256xf32>
    %c0_4 = arith.constant 0 : index
    %c0_5 = arith.constant 0 : index
    %4 = vector.load %arg3[%c0_4, %c0_5] : memref<8x1xf32, #tpu.memory_space<vmem>>, vector<8x1xf32>
    %5 = vector.broadcast %4 : vector<8x1xf32> to vector<8x256xf32>
    %6 = arith.addf %3, %5 : vector<8x256xf32>
    %cst_6 = arith.constant 0.000000e+00 : f32
    %7 = vector.broadcast %cst_6 : f32 to vector<8x256xf32>
    %8 = arith.maximumf %6, %7 : vector<8x256xf32>
    %c17_i32 = arith.constant 17 : i32
    %9 = tpu.dynamic_rotate %8 by %c17_i32 dim 1 : vector<8x256xf32>, i32 -> vector<8x256xf32>
    %c0_7 = arith.constant 0 : index
    %c0_8 = arith.constant 0 : index
    %10 = vector.load %arg8[%c0_7, %c0_8] : memref<9x256xf32, #tpu.memory_space<vmem>>, vector<1x256xf32>
    %11 = vector.shape_cast %10 : vector<1x256xf32> to vector<256xf32>
    %12 = vector.shape_cast %11 : vector<256xf32> to vector<1x256xf32>
    %13 = vector.broadcast %12 : vector<1x256xf32> to vector<8x256xf32>
    %14 = arith.mulf %9, %13 : vector<8x256xf32>
    %c16_i32 = arith.constant 16 : i32
    %15 = tpu.dynamic_rotate %8 by %c16_i32 dim 1 : vector<8x256xf32>, i32 -> vector<8x256xf32>
    %c1 = arith.constant 1 : index
    %c0_9 = arith.constant 0 : index
    %16 = vector.load %arg8[%c1, %c0_9] : memref<9x256xf32, #tpu.memory_space<vmem>>, vector<1x256xf32>
    %17 = vector.shape_cast %16 : vector<1x256xf32> to vector<256xf32>
    %18 = vector.shape_cast %17 : vector<256xf32> to vector<1x256xf32>
    %19 = vector.broadcast %18 : vector<1x256xf32> to vector<8x256xf32>
    %20 = arith.mulf %15, %19 : vector<8x256xf32>
    %c15_i32 = arith.constant 15 : i32
    %21 = tpu.dynamic_rotate %8 by %c15_i32 dim 1 : vector<8x256xf32>, i32 -> vector<8x256xf32>
    %c2 = arith.constant 2 : index
    %c0_10 = arith.constant 0 : index
    %22 = vector.load %arg8[%c2, %c0_10] : memref<9x256xf32, #tpu.memory_space<vmem>>, vector<1x256xf32>
    %23 = vector.shape_cast %22 : vector<1x256xf32> to vector<256xf32>
    %24 = vector.shape_cast %23 : vector<256xf32> to vector<1x256xf32>
    %25 = vector.broadcast %24 : vector<1x256xf32> to vector<8x256xf32>
    %26 = arith.mulf %21, %25 : vector<8x256xf32>
    %c1_i32 = arith.constant 1 : i32
    %27 = tpu.dynamic_rotate %8 by %c1_i32 dim 1 : vector<8x256xf32>, i32 -> vector<8x256xf32>
    %c3 = arith.constant 3 : index
    %c0_11 = arith.constant 0 : index
    %28 = vector.load %arg8[%c3, %c0_11] : memref<9x256xf32, #tpu.memory_space<vmem>>, vector<1x256xf32>
    %29 = vector.shape_cast %28 : vector<1x256xf32> to vector<256xf32>
    %30 = vector.shape_cast %29 : vector<256xf32> to vector<1x256xf32>
    %31 = vector.broadcast %30 : vector<1x256xf32> to vector<8x256xf32>
    %32 = arith.mulf %27, %31 : vector<8x256xf32>
    %c255_i32 = arith.constant 255 : i32
    %33 = tpu.dynamic_rotate %8 by %c255_i32 dim 1 : vector<8x256xf32>, i32 -> vector<8x256xf32>
    %c5 = arith.constant 5 : index
    %c0_12 = arith.constant 0 : index
    %34 = vector.load %arg8[%c5, %c0_12] : memref<9x256xf32, #tpu.memory_space<vmem>>, vector<1x256xf32>
    %35 = vector.shape_cast %34 : vector<1x256xf32> to vector<256xf32>
    %36 = vector.shape_cast %35 : vector<256xf32> to vector<1x256xf32>
    %37 = vector.broadcast %36 : vector<1x256xf32> to vector<8x256xf32>
    %38 = arith.mulf %33, %37 : vector<8x256xf32>
    %c241_i32 = arith.constant 241 : i32
    %39 = tpu.dynamic_rotate %8 by %c241_i32 dim 1 : vector<8x256xf32>, i32 -> vector<8x256xf32>
    %c6 = arith.constant 6 : index
    %c0_13 = arith.constant 0 : index
    %40 = vector.load %arg8[%c6, %c0_13] : memref<9x256xf32, #tpu.memory_space<vmem>>, vector<1x256xf32>
    %41 = vector.shape_cast %40 : vector<1x256xf32> to vector<256xf32>
    %42 = vector.shape_cast %41 : vector<256xf32> to vector<1x256xf32>
    %43 = vector.broadcast %42 : vector<1x256xf32> to vector<8x256xf32>
    %44 = arith.mulf %39, %43 : vector<8x256xf32>
    %c240_i32 = arith.constant 240 : i32
    %45 = tpu.dynamic_rotate %8 by %c240_i32 dim 1 : vector<8x256xf32>, i32 -> vector<8x256xf32>
    %c7 = arith.constant 7 : index
    %c0_14 = arith.constant 0 : index
    %46 = vector.load %arg8[%c7, %c0_14] : memref<9x256xf32, #tpu.memory_space<vmem>>, vector<1x256xf32>
    %47 = vector.shape_cast %46 : vector<1x256xf32> to vector<256xf32>
    %48 = vector.shape_cast %47 : vector<256xf32> to vector<1x256xf32>
    %49 = vector.broadcast %48 : vector<1x256xf32> to vector<8x256xf32>
    %50 = arith.mulf %45, %49 : vector<8x256xf32>
    %c239_i32 = arith.constant 239 : i32
    %51 = tpu.dynamic_rotate %8 by %c239_i32 dim 1 : vector<8x256xf32>, i32 -> vector<8x256xf32>
    %c8 = arith.constant 8 : index
    %c0_15 = arith.constant 0 : index
    %52 = vector.load %arg8[%c8, %c0_15] : memref<9x256xf32, #tpu.memory_space<vmem>>, vector<1x256xf32>
    %53 = vector.shape_cast %52 : vector<1x256xf32> to vector<256xf32>
    %54 = vector.shape_cast %53 : vector<256xf32> to vector<1x256xf32>
    %55 = vector.broadcast %54 : vector<1x256xf32> to vector<8x256xf32>
    %56 = arith.mulf %51, %55 : vector<8x256xf32>
    %57 = tpu.concatenate %14, %20, %26, %32, %8, %38, %44, %50, %56 in 0 : vector<8x256xf32>, vector<8x256xf32>, vector<8x256xf32>, vector<8x256xf32>, vector<8x256xf32>, vector<8x256xf32>, vector<8x256xf32>, vector<8x256xf32>, vector<8x256xf32> -> vector<72x256xf32>
    %c0_16 = arith.constant 0 : index
    %c0_17 = arith.constant 0 : index
    %58 = vector.load %arg4[%c0_16, %c0_17] : memref<8x72xf32, #tpu.memory_space<vmem>>, vector<8x72xf32>
    %cst_18 = arith.constant dense<0.000000e+00> : vector<8x256xf32>
    %59 = tpu.matmul %58, %57, %cst_18 {dimension_numbers = #tpu.dot_dimension_numbers<[1], [0], [0], [1], [0, 0, 1, 1], [], []>} : vector<8x72xf32>, vector<72x256xf32>, vector<8x256xf32> -> vector<8x256xf32>
    %c0_19 = arith.constant 0 : index
    %c0_20 = arith.constant 0 : index
    %60 = vector.load %arg5[%c0_19, %c0_20] : memref<8x1xf32, #tpu.memory_space<vmem>>, vector<8x1xf32>
    %61 = vector.broadcast %60 : vector<8x1xf32> to vector<8x256xf32>
    %62 = arith.addf %59, %61 : vector<8x256xf32>
    %cst_21 = arith.constant 0.000000e+00 : f32
    %63 = vector.broadcast %cst_21 : f32 to vector<8x256xf32>
    %64 = arith.maximumf %62, %63 : vector<8x256xf32>
    %c0_22 = arith.constant 0 : index
    %c0_23 = arith.constant 0 : index
    %65 = vector.load %arg6[%c0_22, %c0_23] : memref<32x8xf32, #tpu.memory_space<vmem>>, vector<32x8xf32>
    %cst_24 = arith.constant dense<0.000000e+00> : vector<32x256xf32>
    %66 = tpu.matmul %65, %64, %cst_24 {dimension_numbers = #tpu.dot_dimension_numbers<[1], [0], [0], [1], [0, 0, 1, 1], [], []>} : vector<32x8xf32>, vector<8x256xf32>, vector<32x256xf32> -> vector<32x256xf32>
    %c0_25 = arith.constant 0 : index
    %c0_26 = arith.constant 0 : index
    %67 = vector.load %arg7[%c0_25, %c0_26] : memref<32x1xf32, #tpu.memory_space<vmem>>, vector<32x1xf32>
    %68 = vector.broadcast %67 : vector<32x1xf32> to vector<32x256xf32>
    %69 = arith.addf %66, %68 : vector<32x256xf32>
    %70 = arith.addf %69, %1 : vector<32x256xf32>
    %cst_27 = arith.constant 0.000000e+00 : f32
    %71 = vector.broadcast %cst_27 : f32 to vector<32x256xf32>
    %72 = arith.maximumf %70, %71 : vector<32x256xf32>
    %c0_28 = arith.constant 0 : index
    %c0_29 = arith.constant 0 : index
    %c0_30 = arith.constant 0 : index
    %73 = vector.load %arg9[%c0_28, %c0_29, %c0_30] : memref<1x32x256xf32, #tpu.memory_space<vmem>>, vector<1x32x256xf32>
    %74 = vector.shape_cast %73 : vector<1x32x256xf32> to vector<32x256xf32>
    %75 = vector.shape_cast %72 : vector<32x256xf32> to vector<1x32x256xf32>
    tpu.vector_store %arg9[%c0_28, %c0_29, %c0_30], %75 {strides = array<i32>} : memref<1x32x256xf32, #tpu.memory_space<vmem>>, vector<1x32x256xf32>,
    return
  }
  func.func @transform_0(%arg0: i32) -> (i32, i32, i32) {
    %c0_i32 = arith.constant 0 : i32
    %c0_i32_0 = arith.constant 0 : i32
    %c0_i32_1 = arith.constant 0 : i32
    return %arg0, %c0_i32, %c0_i32_0 : i32, i32, i32
  }
  func.func @transform_1(%arg0: i32) -> (i32, i32) {
    %c0_i32 = arith.constant 0 : i32
    %c0_i32_0 = arith.constant 0 : i32
    %c0_i32_1 = arith.constant 0 : i32
    return %c0_i32, %c0_i32_0 : i32, i32
  }
  func.func @transform_2(%arg0: i32) -> (i32, i32) {
    %c0_i32 = arith.constant 0 : i32
    %c0_i32_0 = arith.constant 0 : i32
    %c0_i32_1 = arith.constant 0 : i32
    return %c0_i32, %c0_i32_0 : i32, i32
  }
  func.func @transform_3(%arg0: i32) -> (i32, i32) {
    %c0_i32 = arith.constant 0 : i32
    %c0_i32_0 = arith.constant 0 : i32
    %c0_i32_1 = arith.constant 0 : i32
    return %c0_i32, %c0_i32_0 : i32, i32
  }
  func.func @transform_4(%arg0: i32) -> (i32, i32) {
    %c0_i32 = arith.constant 0 : i32
    %c0_i32_0 = arith.constant 0 : i32
    %c0_i32_1 = arith.constant 0 : i32
    return %c0_i32, %c0_i32_0 : i32, i32
  }
  func.func @transform_5(%arg0: i32) -> (i32, i32) {
    %c0_i32 = arith.constant 0 : i32
    %c0_i32_0 = arith.constant 0 : i32
    %c0_i32_1 = arith.constant 0 : i32
    return %c0_i32, %c0_i32_0 : i32, i32
  }
  func.func @transform_6(%arg0: i32) -> (i32, i32) {
    %c0_i32 = arith.constant 0 : i32
    %c0_i32_0 = arith.constant 0 : i32
    %c0_i32_1 = arith.constant 0 : i32
    return %c0_i32, %c0_i32_0 : i32, i32
  }
  func.func @transform_7(%arg0: i32) -> (i32, i32) {
    %c0_i32 = arith.constant 0 : i32
    %c0_i32_0 = arith.constant 0 : i32
    %c0_i32_1 = arith.constant 0 : i32
    return %c0_i32, %c0_i32_0 : i32, i32
  }
  func.func @transform_8(%arg0: i32) -> (i32, i32, i32) {
    %c0_i32 = arith.constant 0 : i32
    %c0_i32_0 = arith.constant 0 : i32
    %c0_i32_1 = arith.constant 0 : i32
    return %arg0, %c0_i32, %c0_i32_0 : i32, i32, i32
  }
}

</mosaic_0001>

<bundles_post_ra>
// kernel: tpu_custom_call.1
= control target key start
LH: loop header
LB: loop body
LE: loop exit
PB: predicated region body
PF: predicated region fallthrough
CT: control target
= control target key end

     0   :  { %13 = vsyncpa [#allocation3], 0  ;;  %s1500_s0 = inlined_call_operand.hbm [shape: f32[2,32,256], index: 0, kind: input, shape index: {}]   ;;  %s1501_s1 = inlined_call_operand.vmem [shape: f32[8,32], index: 1, kind: input, shape index: {}]   ;;  %s1502_s2 = inlined_call_operand.vmem [shape: f32[8,1], index: 2, kind: input, shape index: {}]   ;;  %s1503_s3 = inlined_call_operand.vmem [shape: f32[8,72], index: 3, kind: input, shape index: {}]   ;;  %s1504_s4 = inlined_call_operand.vmem [shape: f32[8,1], index: 4, kind: input, shape index: {}]   ;;  %s1505_s5 = inlined_call_operand.vmem [shape: f32[32,8], index: 5, kind: input, shape index: {}]   ;;  %s1506_s6 = inlined_call_operand.vmem [shape: f32[32,1], index: 6, kind: input, shape index: {}]   ;;  %s1507_s7 = inlined_call_operand.vmem [shape: f32[9,256], index: 7, kind: input, shape index: {}]   ;;  %s1508_s8 = inlined_call_operand.hbm [shape: f32[2,32,256], index: 8, kind: output, shape index: {}]  }
   0x1   :  { %15 = vsyncpa [#allocation3 + $0x1], 0 }
   0x2   :  { %16 = vsyncpa [#allocation4], 0 }
   0x3   :  { %18 = vsyncpa [#allocation4 + $0x1], 0  ;;  %s1162_s27 = smov 0   ;;  %s1164_s28 = smov 0  }
   0x4   :  { %s1166_s29 = smov 0   ;;  %s1168_s30 = smov 0  }
   0x5 LB: > { %s1183_s9 = sadd.s32 4294967295, %s1100_s30   ;;  %s918_s10 = sadd.s32 4294967294, %s1100_s30   ;;  %s1100_s30 = sphi %s1168_s30, %s1525_s30   ;;  %s1096_s29 = sphi %s1166_s29, %s1524_s29   ;;  %s1092_s28 = sphi %s1164_s28, %s1523_s28   ;;  %s1088_s27 = sphi %s1162_s27, %s1522_s27  }
   0x6   : > { %s1187_s11 = sadd.s32 1, %s1100_s30   ;;  %s31_s12 = sadd.s32 1, %s1096_s29 }
   0x7   : > { %s28_s13 = ssub.s32 %s1100_s30, %s1187_s11  ;;  %p38_p0 = scmp.ne.s32.totalorder %s1096_s29, %s1092_s28 }
   0x8   : > { %p29_p1 = scmp.eq.s32.totalorder %s28_s13, 0  ;;  %p39_p2 = scmp.eq.s32.totalorder %s1100_s30, 0 }
   0x9   : > { %p44_p3 = scmp.ne.s32.totalorder %s1092_s28, %s1088_s27  ;;  %p45_p4 = scmp.eq.s32.totalorder %s1183_s9, 0 }
   0xa   : > { %s1199_s14 = scalar_select %p29_p1, %s1096_s29, %s31_s12  }
   0xb   : > { %p1201_p5 = por %p39_p2, %p38_p0  ;;  %p1205_p6 = por %p45_p4, %p44_p3 }
   0xc   : > { %1511 = sst [smem:[#allocation8_spill]] %s1199_s14  ;;  %p215_p7 = scmp.eq.s32.totalorder %s1183_s9, 1 }
   0xd   : > { %s1513_s16 = scalar_select %p1205_p6, 1, 0 }
   0xe   : > { %p221_p8 = scmp.eq.s32.totalorder %s918_s10, 1  ;;  %p959_p10 = scmp.lt.s32.totalorder %s1100_s30, 2 }
   0xf   : > { %p1212_p11 = por %p215_p7, %p38_p0  ;;  %s262_s19 = sand.u32 1, %s1096_s29  }
  0x10   : > { %p1216_p12 = por %p221_p8, %p44_p3  ;;  %s945_s20 = sshll.u32 %s1100_s30, 10 }
  0x11   : > { %s1514_s17 = scalar_select %p1212_p11, 1, 0 }
  0x12   : > { %s1515_s18 = scalar_select %p1216_p12, 1, 0 }
  0x13   : > { %s921_s21 = sshll.u32 %s262_s19, 6  ;;  %s1225_s24 = scalar_lea.hbm %s1500_s0, %s945_s20 }
  0x14   : > { %s266_s25 = scalar_lea.vmem [#allocation2], %s921_s21  ;;  %p1229_p13 = pnand %p959_p10, %p1201_p5 }
  0x15   : > { %s273_s26 = sshll.u32 %s266_s25, 4  ;;  %s1235_s12 = scalar_lea.sflag [#allocation3], %s262_s19  ;;  %s1233_s26 = int_to_ptr.vmem [resolvable:$true] %s273_s26 }
  0x16   : > { %s1008_s13 = scalar_lea.hbm %s1225_s24, 1024  ;;  %p1010_p1 = pneg %p1229_p13 }
  0x17   : > { %p1009_p0 = scmp.ne.s32.totalorder %s1225_s24, %s1008_s13  ;;  %s1013_s21 = scalar_lea.hbm %s1500_s0, 2048 }
  0x18   : > { %p1014_p4 = scmp.lt.s32.totalorder %s1225_s24, %s1500_s0  ;;  %p1015_p5 = scmp.lt.s32.totalorder %s1013_s21, %s1008_s13 }
  0x19   : > { %p1011_p2 = pnand %p1010_p1, %p1009_p0 }
  0x1a   : > { %p1016_p7 = por %p1015_p5, %p1014_p4 }
  0x1b   : > { %p1012_p3 = pneg %p1011_p2 }
  0x1d   : > { %p1017_p8 = pnand %p1016_p7, %p1012_p3 }
  0x1f   : > { %1020 = shalt.err (!%p1017_p8)
}
  0x20   : > { %s1021_s19 = scalar_lea.vmem %s1233_s26, 1024  ;;  %s1102_s25 = smov [#allocation2]  }
  0x21   : > { %p1022_p10 = scmp.ne.s32.totalorder %s1233_s26, %s1021_s19  ;;  %s1026_s14 = sshll.u32 %s1102_s25, 4  ;;  %s1027_s14 = int_to_ptr.vmem [resolvable:$false] %s1026_s14 }
  0x22   : > { %s1028_s20 = scalar_lea.vmem %s1027_s14, 2048  ;;  %p1029_p2 = scmp.lt.s32.totalorder %s1233_s26, %s1027_s14 }
  0x23   : > { %p1024_p9 = pnand %p1022_p10, %p1010_p1  ;;  %p1030_p12 = scmp.lt.s32.totalorder %s1028_s20, %s1021_s19 }
  0x25   : > { %p1025_p0 = pneg %p1024_p9  ;;  %p1031_p11 = por %p1030_p12, %p1029_p2 }
  0x27   : > { %p1032_p6 = pnand %p1031_p11, %p1025_p0 }
  0x29   : > { %1035 = shalt.err (!%p1032_p6)
}
  0x2a   : > { %s1103_s13 = smov 256   ;;  %s1104_s22 = smov 16  }
  0x2b   : > { %954 = dma.hbm_to_vmem [thread:$0]  (!%p1229_p13), %s1225_s24, 1024, %s1233_s26, %s1235_s12, %s1103_s13, %s1103_s13, %s1104_s22  }
  0x2c   : > { %p924_p9 = scmp.ge.s32.totalorder %s1100_s30, 1  ;;  %p281_p1 = scmp.lt.s32.totalorder %s1100_s30, 3 }
  0x2e   : > { %p282_p3 = pnand %p924_p9, %p281_p1 }
  0x2f   : > { %s1259_s14 = sand.u32 (!%p282_p3), 1, %s1092_s28   ;;  %p1517_p6 = scmp.ne.s32.totalorder (!%p282_p3), %s1513_s16, 0 }
  0x30   : > { %285 = sbr.rel (%p282_p3) target bundleno = 838 (0x346), region = 52  ;;  %s925_s21 = sshll.u32 (!%p282_p3), %s1259_s14, 6 }
  0x31   : > { %s288_s15 = scalar_lea.sflag (!%p282_p3), [#allocation3], %s1259_s14  ;;  %s291_s23 = scalar_lea.vmem (!%p282_p3), [#allocation2], %s925_s21 }
  0x35   : > { %1079 = dma.done.wait (%p1517_p6), %s288_s15, 1024  }
  0x36   : > { %1081 = vsyncadd (%p1517_p6), %s288_s15, 4294966272  ;;  %v1105_v0 = vmov 0.0   ;;  %v1106_v1 = vmov 0   ;;  %v1271_v2 = vld [vmem:[%s291_s23 + $0x38] sm:$0xff]  ;;  %v1273_v3 = vld [vmem:[%s291_s23 + $0x30] sm:$0xff]  ;;  %vm339_vm0 = vcmask 261120   ;;  %v420_v26 = vlaneseq }
  0x37   : > { %407 = vmatprep.mubr.f32.mxu0 %v1105_v0  ;;  %1006 = vset.pattern.permute.xlu0 %v1106_v1  ;;  %v1275_v4 = vld [vmem:[%s291_s23 + $0x28] sm:$0xff]  ;;  %v1278_v5 = vld [vmem:[%s291_s23 + $0x20] sm:$0xff]  ;;  %v1281_v6 = vld [vmem:[%s291_s23 + $0x18] sm:$0xff]  ;;  %s1107_s12 = smov 112   ;;  %s1108_s19 = smov 111   ;;  %vm600_vm9 = vcmask 588800  }
  0x38   : > { %668 = vmatprep.mubr.f32.mxu1 %v1105_v0  ;;  %1007 = vset.pattern.permute.xlu1 %v1106_v1  ;;  %v1284_v7 = vld [vmem:[%s291_s23 + $0x10] sm:$0xff]  ;;  %v333_v8 = vld [vmem:[%s1502_s2] sm:$0xff]  ;;  %v1290_v9 = vld [vmem:[%s291_s23 + $0x8] sm:$0xff]  ;;  %s1109_s25 = smov 113   ;;  %s1110_s20 = smov 127   ;;  %v428_v28 = vshrl.u32 %v420_v26, 7 }
  0x39   : > { %367 = vmatprep.subr.mxu0 %v1271_v2  ;;  %336 = vperm.xlu0 %1006, %v333_v8   ;;  %v1293_v10 = vld [vmem:[%s291_s23] sm:$0xff]  ;;  %s1111_s13 = smov 1   ;;  %s1112_s22 = smov 15   ;;  %v683_v21 = vld [vmem:[%s1506_s6 + $0x10] sm:$0xff]  ;;  %v682_v22 = vld [vmem:[%s1506_s6 + $0x8] sm:$0xff]  ;;  %v1339_v30 = vand.u32 127, %v420_v26 }
  0x3a   : > { %368 = vmatpush1.msra.mxu0 %v1273_v3  ;;  %v332_v11 = vld [vmem:[%s1501_s1] sm:$0xff]  ;;  %s1113_s15 = smov 16   ;;  %s1114_s23 = smov 17   ;;  %v684_v23 = vld [vmem:[%s1506_s6 + $0x18] sm:$0xff]  ;;  %v1344_v32 = vsub.s32 0, %v428_v28  ;;  %v1346_v33 = vsub.s32 1, %v428_v28 }
  0x3b   : > { %369 = vmatprep.subr.mxu0 %v1275_v4  ;;  %v681_v19 = vld [vmem:[%s1506_s6] sm:$0xff]  ;;  %v934_v31 = vld [vmem:[%s1507_s7 + $0x10] ss:$8 sm:$0x3]  ;;  %vm553_vm1 = vcmp.lt.s32.totalorder %v1339_v30, 112  ;;  %vm575_vm2 = vcmp.lt.s32.totalorder %v1339_v30, 111 }
  0x3c   : > { %370 = vmatpush1.msra.mxu0 %v1278_v5  ;;  %v594_v20 = vld [vmem:[%s1504_s4] sm:$0xff]  ;;  %v588_v38 = vrot.slane %v934_v31, %v1346_v33  ;;  %v584_v39 = vrot.slane %v934_v31, %v1344_v32  ;;  %vm531_vm3 = vcmp.lt.s32.totalorder %v1339_v30, 113  ;;  %vm509_vm4 = vcmp.lt.s32.totalorder %v1339_v30, 127  ;;  %s1433_s10 = scalar_lea.vmem [#allocation5], %s925_s21  ;;  %p1518_p12 = scmp.ne.s32.totalorder %s1514_s17, 0 }
  0x3d   : > { %371 = vmatprep.subr.mxu0 %v1281_v6  ;;  %v933_v36 = vld [vmem:[%s1507_s7 + $0x7] ss:$8 sm:$0x3]  ;;  %v932_v37 = vld [vmem:[%s1507_s7 + $0x6] ss:$8 sm:$0x3] }
  0x3e   : > { %372 = vmatpush1.msra.mxu0 %v1284_v7  ;;  %v562_v40 = vrot.slane %v933_v36, %v1344_v32  ;;  %v566_v41 = vrot.slane %v933_v36, %v1346_v33  ;;  %v544_v45 = vrot.slane %v932_v37, %v1346_v33  ;;  %v931_v47 = vld [vmem:[%s1507_s7 + $0x5] ss:$8 sm:$0x3]  ;;  %v540_v52 = vrot.slane %v932_v37, %v1344_v32  ;;  %v930_v62 = vld [vmem:[%s1507_s7 + $0x3] ss:$8 sm:$0x3] }
  0x3f   : > { %373 = vmatprep.subr.mxu0 %v1290_v9  ;;  %v522_v56 = vrot.slane %v931_v47, %v1346_v33  ;;  %v518_v60 = vrot.slane %v931_v47, %v1344_v32  ;;  %vm487_vm5 = vcmp.lt.s32.totalorder %v1339_v30, 1  ;;  %vm465_vm6 = vcmp.lt.s32.totalorder %v1339_v30, 15  ;;  %v425_v26 = vld [vmem:[%s1507_s7] ss:$8 sm:$0x3]  ;;  %s845_s21 = sshll.u32 %s1433_s10, 4  ;;  %s1449_s21 = int_to_ptr.vmem [resolvable:$true] %s845_s21 }
  0x40   : > { %374 = vmatpush1.msra.mxu0 %v1293_v10  ;;  %vm443_vm7 = vcmp.lt.s32.totalorder %v1339_v30, 16  ;;  %vm422_vm8 = vcmp.lt.s32.totalorder %v1339_v30, 17  ;;  %v593_v30 = vld [vmem:[%s1503_s3] sm:$0xff]  ;;  %vm705_vm10 = vcmask 64512  }
  0x41   : > { %927 = vmatmul.mubr.msk.f32.vlgmr.msra.gmra.mxu0 %vm339_vm0, %v332_v11  ;;  %v929_v11 = vld [vmem:[%s1507_s7 + $0x2] ss:$8 sm:$0x3] }
  0x42   : > { %782 = vmatprep.mubr.f32.mxu0 %v1105_v0 }
  0xb4   : > { %v337_v12 = vpop.permute.xlu0 %336 }
 0x101   : > { %v409_v13 = vpop.f32.mrf.mxu0 }
 0x102   : > { %v410_v14 = vadd.f32 %v409_v13, %v337_v12  ;;  %v500_v13 = vrot.slane %v930_v62, %v1346_v33 }
 0x103   : > { %v411_v15 = vpop.f32.mrf.mxu0 }
 0x104   : > { %v1302_v16 = vmax.f32 %v410_v14, 0.0  ;;  %v412_v17 = vadd.f32 %v411_v15, %v337_v12 }
 0x106   : > { %549 = vrot.lane.b32.xlu1 %v1302_v16, %s1107_s12  ;;  %571 = vrot.lane.b32.xlu0 %v1302_v16, %s1108_s19  ;;  %v1306_v18 = vmax.f32 %v412_v17, 0.0 }
 0x10a   : > { %527 = vrot.lane.b32.xlu1 %v1302_v16, %s1109_s25  ;;  %551 = vrot.lane.b32.xlu0 %v1306_v18, %s1107_s12  ;;  %s946_s12 = sshll.u32 %s1183_s9, 10  ;;  %s1115_s9 = smov [#allocation5]  }
 0x10e   : > { %505 = vrot.lane.b32.xlu1 %v1302_v16, %s1110_s20  ;;  %529 = vrot.lane.b32.xlu0 %v1306_v18, %s1109_s25 }
 0x112   : > { %573 = vrot.lane.b32.xlu1 %v1306_v18, %s1108_s19  ;;  %507 = vrot.lane.b32.xlu0 %v1306_v18, %s1110_s20  ;;  %s1455_s20 = scalar_lea.hbm %s1508_s8, %s946_s12 }
 0x116   : > { %483 = vrot.lane.b32.xlu1 %v1302_v16, %s1111_s13  ;;  %485 = vrot.lane.b32.xlu0 %v1306_v18, %s1111_s13  ;;  %s832_s13 = scalar_lea.sflag [#allocation4], %s1259_s14 }
 0x11a   : > { %461 = vrot.lane.b32.xlu1 %v1302_v16, %s1112_s22  ;;  %463 = vrot.lane.b32.xlu0 %v1306_v18, %s1112_s22  ;;  %s1036_s22 = scalar_lea.vmem %s1449_s21, 1024 }
 0x11b   : > { %p1037_p11 = scmp.ne.s32.totalorder %s1449_s21, %s1036_s22 }
 0x11d   : > { %p1038_p13 = pnand %p1037_p11, %p1518_p12 }
 0x11e   : > { %439 = vrot.lane.b32.xlu1 %v1302_v16, %s1113_s15  ;;  %441 = vrot.lane.b32.xlu0 %v1306_v18, %s1113_s15 }
 0x11f   : > { %p1039_p4 = pneg %p1038_p13 }
 0x122   : > { %416 = vrot.lane.b32.xlu1 %v1302_v16, %s1114_s23  ;;  %418 = vrot.lane.b32.xlu0 %v1306_v18, %s1114_s23  ;;  %s1040_s23 = sshll.u32 %s1115_s9, 4  ;;  %s1041_s23 = int_to_ptr.vmem [resolvable:$false] %s1040_s23 }
 0x123   : > { %s1042_s16 = scalar_lea.vmem %s1041_s23, 2048  ;;  %p1043_p5 = scmp.lt.s32.totalorder %s1449_s21, %s1041_s23 }
 0x124   : > { %p1044_p7 = scmp.lt.s32.totalorder %s1042_s16, %s1036_s22 }
 0x126   : > { %687 = vperm.xlu0 %1006, %v681_v19   ;;  %597 = vperm.xlu1 %1007, %v594_v20   ;;  %v496_v19 = vrot.slane %v930_v62, %v1344_v32  ;;  %p1045_p8 = por %p1044_p7, %p1043_p5 }
 0x128   : > { %p1046_p10 = pnand %p1045_p8, %p1039_p4 }
 0x12a   : > { %697 = vperm.xlu0 %1006, %v683_v21   ;;  %692 = vperm.xlu1 %1007, %v682_v22   ;;  %v928_v21 = vld [vmem:[%s1507_s7 + $0x1] ss:$8 sm:$0x3] }
 0x12b   : > { %v456_v31 = vrot.slane %v928_v21, %v1346_v33  ;;  %v452_v36 = vrot.slane %v928_v21, %v1344_v32 }
 0x12e   : > { %702 = vperm.xlu1 %1007, %v684_v23   ;;  %v478_v23 = vrot.slane %v929_v11, %v1346_v33 }
 0x178   : > { %v550_v24 = vpop.permute.xlu1 %549  ;;  %v572_v25 = vpop.permute.xlu0 %571 }
 0x17c   : > { %v528_v27 = vpop.permute.xlu1 %527  ;;  %v552_v29 = vpop.permute.xlu0 %551 }
 0x17d   : > { %v555_v44 = vsel %vm553_vm1, %v552_v29, %v550_v24  ;;  %v554_v49 = vsel %vm553_vm1, %v550_v24, %v552_v29  ;;  %v474_v24 = vrot.slane %v929_v11, %v1344_v32 }
 0x17e   : > { %v570_v54 = vmul.f32 %v566_v41, %v555_v44  ;;  %v569_v59 = vmul.f32 %v562_v40, %v554_v49  ;;  %v434_v40 = vrot.slane %v425_v26, %v1346_v33 }
 0x180   : > { %v506_v34 = vpop.permute.xlu1 %505  ;;  %v530_v35 = vpop.permute.xlu0 %529 }
 0x181   : > { %v533_v53 = vsel %vm531_vm3, %v530_v35, %v528_v27  ;;  %v532_v55 = vsel %vm531_vm3, %v528_v27, %v530_v35 }
 0x182   : > { %v548_v63 = vmul.f32 %v544_v45, %v533_v53  ;;  %v547_v8 = vmul.f32 %v540_v52, %v532_v55  ;;  %v678_v55 = vld [vmem:[%s1505_s5 + $0x8] sm:$0xff] }
 0x184   : > { %v574_v42 = vpop.permute.xlu1 %573  ;;  %v508_v43 = vpop.permute.xlu0 %507 }
 0x185   : > { %v576_v46 = vsel %vm575_vm2, %v572_v25, %v574_v42  ;;  %v577_v48 = vsel %vm575_vm2, %v574_v42, %v572_v25  ;;  %v511_v61 = vsel %vm509_vm4, %v508_v43, %v506_v34  ;;  %v510_v1 = vsel %vm509_vm4, %v506_v34, %v508_v43 }
 0x186   : > { %v592_v50 = vmul.f32 %v588_v38, %v577_v48  ;;  %v591_v51 = vmul.f32 %v584_v39, %v576_v46  ;;  %v526_v12 = vmul.f32 %v522_v56, %v511_v61  ;;  %v525_v17 = vmul.f32 %v518_v60, %v510_v1  ;;  %v679_v56 = vld [vmem:[%s1505_s5 + $0x10] sm:$0xff] }
 0x188   : > { %v484_v57 = vpop.permute.xlu1 %483  ;;  %618 = vmatprep.subr.mxu1 %v592_v50  ;;  %v486_v58 = vpop.permute.xlu0 %485 }
 0x189   : > { %619 = vmatpush1.msra.mxu1 %v591_v51  ;;  %v488_v20 = vsel %vm487_vm5, %v484_v57, %v486_v58  ;;  %v489_v22 = vsel %vm487_vm5, %v486_v58, %v484_v57  ;;  %v680_v57 = vld [vmem:[%s1505_s5 + $0x18] sm:$0xff] }
 0x18a   : > { %620 = vmatprep.subr.mxu1 %v570_v54  ;;  %v504_v27 = vmul.f32 %v500_v13, %v488_v20  ;;  %v503_v35 = vmul.f32 %v496_v19, %v489_v22  ;;  %v677_v54 = vld [vmem:[%s1505_s5] sm:$0xff] }
 0x18b   : > { %621 = vmatpush1.msra.mxu1 %v569_v59 }
 0x18c   : > { %v462_v14 = vpop.permute.xlu1 %461  ;;  %622 = vmatprep.subr.mxu1 %v548_v63  ;;  %v464_v15 = vpop.permute.xlu0 %463 }
 0x18d   : > { %623 = vmatpush1.msra.mxu1 %v547_v8  ;;  %v466_v25 = vsel %vm465_vm6, %v462_v14, %v464_v15  ;;  %v467_v28 = vsel %vm465_vm6, %v464_v15, %v462_v14 }
 0x18e   : > { %624 = vmatprep.subr.mxu1 %v526_v12  ;;  %v482_v38 = vmul.f32 %v478_v23, %v466_v25  ;;  %v481_v41 = vmul.f32 %v474_v24, %v467_v28 }
 0x18f   : > { %625 = vmatpush1.msra.mxu1 %v525_v17 }
 0x190   : > { %v440_v29 = vpop.permute.xlu1 %439  ;;  %626 = vmatprep.subr.mxu1 %v1306_v18  ;;  %v442_v34 = vpop.permute.xlu0 %441  ;;  %v430_v18 = vrot.slane %v425_v26, %v1344_v32 }
 0x191   : > { %v444_v37 = vsel %vm443_vm7, %v440_v29, %v442_v34  ;;  %627 = vmatpush1.msra.mxu1 %v1302_v16  ;;  %v445_v39 = vsel %vm443_vm7, %v442_v34, %v440_v29 }
 0x192   : > { %628 = vmatprep.subr.mxu1 %v504_v27  ;;  %v460_v42 = vmul.f32 %v456_v31, %v444_v37  ;;  %v459_v45 = vmul.f32 %v452_v36, %v445_v39 }
 0x193   : > { %629 = vmatpush1.msra.mxu1 %v503_v35 }
 0x194   : > { %v417_v43 = vpop.permute.xlu1 %416  ;;  %630 = vmatprep.subr.mxu1 %v482_v38  ;;  %v419_v44 = vpop.permute.xlu0 %418 }
 0x195   : > { %v423_v46 = vsel %vm422_vm8, %v417_v43, %v419_v44  ;;  %v424_v16 = vsel %vm422_vm8, %v419_v44, %v417_v43  ;;  %631 = vmatpush1.msra.mxu1 %v481_v41 }
 0x196   : > { %v437_v47 = vmul.f32 %v430_v18, %v424_v16  ;;  %v438_v48 = vmul.f32 %v434_v40, %v423_v46  ;;  %632 = vmatprep.subr.mxu1 %v460_v42 }
 0x197   : > { %633 = vmatpush1.msra.mxu1 %v459_v45 }
 0x198   : > { %634 = vmatprep.subr.mxu1 %v438_v48 }
 0x199   : > { %635 = vmatpush1.msra.mxu1 %v437_v47 }
 0x19a   : > { %935 = vmatmul.mubr.msk.f32.vlgmr.msra.gmra.mxu1 %vm600_vm9, %v593_v30 }
 0x1a1   : > { %v598_v33 = vpop.permute.xlu1 %597  ;;  %v688_v58 = vpop.permute.xlu0 %687 }
 0x1a5   : > { %v693_v1 = vpop.permute.xlu1 %692  ;;  %v698_v17 = vpop.permute.xlu0 %697 }
 0x1a9   : > { %v703_v26 = vpop.permute.xlu1 %702 }
 0x25a   : > { %v670_v32 = vpop.f32.mrf.mxu1 }
 0x25b   : > { %v671_v49 = vadd.f32 %v670_v32, %v598_v33 }
 0x25c   : > { %v672_v50 = vpop.f32.mrf.mxu1 }
 0x25d   : > { %v673_v51 = vadd.f32 %v672_v50, %v598_v33  ;;  %v675_v53 = vmax.f32 %v671_v49, 0.0 }
 0x25f   : > { %v676_v52 = vmax.f32 %v673_v51, 0.0 }
 0x261   : > { %748 = vmatprep.subr.mxu0 %v676_v52 }
 0x262   : > { %749 = vmatpush1.msra.mxu0 %v675_v53 }
 0x263   : > { %936 = vmatmul.mubr.msk.f32.vlgmr.msra.gmra.mxu0 %vm705_vm10, %v677_v54 }
 0x264   : > { %788 = vmatprep.mubr.f32.mxu0 %v1105_v0 }
 0x267   : > { %937 = vmatmul.mubr.msk.f32.gmra.mxu0 %vm705_vm10, %v678_v55 }
 0x268   : > { %794 = vmatprep.mubr.f32.mxu0 %v1105_v0 }
 0x26b   : > { %938 = vmatmul.mubr.msk.f32.gmra.mxu0 %vm705_vm10, %v679_v56 }
 0x26c   : > { %800 = vmatprep.mubr.f32.mxu0 %v1105_v0 }
 0x26f   : > { %939 = vmatmul.mubr.msk.f32.gmra.mxu0 %vm705_vm10, %v680_v57 }
 0x323   : > { %v784_v59 = vpop.f32.mrf.mxu0 }
 0x324   : > { %v785_v60 = vadd.f32 %v784_v59, %v688_v58 }
 0x325   : > { %v786_v61 = vpop.f32.mrf.mxu0 }
 0x326   : > { %v807_v62 = vadd.f32 %v785_v60, %v1293_v10  ;;  %v787_v63 = vadd.f32 %v786_v61, %v688_v58 }
 0x327   : > { %v790_v8 = vpop.f32.mrf.mxu0 }
 0x328   : > { %v815_v11 = vmax.f32 %v807_v62, 0.0  ;;  %v808_v12 = vadd.f32 %v787_v63, %v1290_v9  ;;  %v791_v13 = vadd.f32 %v790_v8, %v693_v1 }
 0x329   : > { %v792_v14 = vpop.f32.mrf.mxu0 }
 0x32a   : > { %823 = vst [vmem:[%s1433_s10] sm:$0xff] %v815_v11  ;;  %v816_v0 = vmax.f32 %v808_v12, 0.0  ;;  %v809_v15 = vadd.f32 %v791_v13, %v1284_v7  ;;  %v793_v10 = vadd.f32 %v792_v14, %v693_v1 }
 0x32b   : > { %v796_v19 = vpop.f32.mrf.mxu0 }
 0x32c   : > { %824 = vst [vmem:[%s1433_s10 + $0x8] sm:$0xff] %v816_v0  ;;  %v817_v20 = vmax.f32 %v809_v15, 0.0  ;;  %v810_v9 = vadd.f32 %v793_v10, %v1281_v6  ;;  %v797_v21 = vadd.f32 %v796_v19, %v698_v17 }
 0x32d   : > { %v798_v22 = vpop.f32.mrf.mxu0 }
 0x32e   : > { %825 = vst [vmem:[%s1433_s10 + $0x10] sm:$0xff] %v817_v20  ;;  %v818_v23 = vmax.f32 %v810_v9, 0.0  ;;  %v811_v24 = vadd.f32 %v797_v21, %v1278_v5  ;;  %v799_v25 = vadd.f32 %v798_v22, %v698_v17 }
 0x32f   : > { %v802_v7 = vpop.f32.mrf.mxu0 }
 0x330   : > { %826 = vst [vmem:[%s1433_s10 + $0x18] sm:$0xff] %v818_v23  ;;  %v819_v27 = vmax.f32 %v811_v24, 0.0  ;;  %v812_v28 = vadd.f32 %v799_v25, %v1275_v4  ;;  %v803_v29 = vadd.f32 %v802_v7, %v703_v26 }
 0x331   : > { %v804_v6 = vpop.f32.mrf.mxu0 }
 0x332   : > { %827 = vst [vmem:[%s1433_s10 + $0x20] sm:$0xff] %v819_v27  ;;  %v820_v31 = vmax.f32 %v812_v28, 0.0  ;;  %v813_v34 = vadd.f32 %v803_v29, %v1273_v3  ;;  %v805_v35 = vadd.f32 %v804_v6, %v703_v26 }
 0x334   : > { %828 = vst [vmem:[%s1433_s10 + $0x28] sm:$0xff] %v820_v31  ;;  %v821_v5 = vmax.f32 %v813_v34, 0.0  ;;  %v814_v36 = vadd.f32 %v805_v35, %v1271_v2 }
 0x336   : > { %829 = vst [vmem:[%s1433_s10 + $0x30] sm:$0xff] %v821_v5  ;;  %v822_v4 = vmax.f32 %v814_v36, 0.0 }
 0x338   : > { %830 = vst [vmem:[%s1433_s10 + $0x38] sm:$0xff] %v822_v4 }
 0x339   : > { %1049 = shalt.err (!%p1046_p10)
}
 0x33a   : > { %s1050_s24 = scalar_lea.hbm %s1455_s20, 1024  ;;  %s1054_s12 = scalar_lea.hbm %s1508_s8, 2048 }
 0x33b   : > { %p1051_p0 = scmp.ne.s32.totalorder %s1455_s20, %s1050_s24  ;;  %p1055_p1 = scmp.lt.s32.totalorder %s1455_s20, %s1508_s8 }
 0x33c   : > { %p1056_p3 = scmp.lt.s32.totalorder %s1054_s12, %s1050_s24 }
 0x33d   : > { %p1052_p2 = pnand %p1051_p0, %p1518_p12 }
 0x33e   : > { %p1057_p6 = por %p1056_p3, %p1055_p1 }
 0x33f   : > { %p1053_p9 = pneg %p1052_p2 }
 0x341   : > { %p1058_p11 = pnand %p1057_p6, %p1053_p9 }
 0x343   : > { %1061 = shalt.err (!%p1058_p11)
}
 0x344   : > { %s1116_s22 = smov 256  }
 0x345   : > { %949 = dma.vmem_to_hbm [thread:$0]  (%p1518_p12), %s1449_s21, 1024, %s1455_s20, %s832_s13, %s1116_s22, %s1116_s22, %s1113_s15  }
 0x346 PF: > { %s860_s9 = sand.u32 1, %s1088_s27   ;;  %p1519_p13 = scmp.ne.s32.totalorder %s1515_s18, 0 }
 0x347   : > { %p1520_p4 = scmp.ge.s32.totalorder %s1100_s30, 2  ;;  %s861_s23 = scalar_lea.sflag [#allocation4], %s860_s9 }
 0x349   : > { %p956_p5 = pnand %p1520_p4, %p1519_p13 }
 0x34b   : > { %p957_p7 = pneg %p956_p5 }
 0x34d   : > { %1083 = dma.done.wait (%p957_p7), %s861_s23, 1024  }
 0x34e   : > { %1085 = vsyncadd (%p957_p7), %s861_s23, 4294966272  ;;  %s1521_s17 = sld [smem:[#allocation8_spill]]  ;;  %p21_p8 = scmp.ge.s32.totalorder %s1187_s11, 4  }
 0x34f   : > { %s1522_s27 = smov %s1092_s28  ;;  %s1523_s28 = smov %s1096_s29 }
 0x350   : > { %s1525_s30 = smov %s1187_s11  ;;  %23 = sbr.rel (!%p21_p8) target bundleno = 5 (0x5), region = 104 }
 0x354   : > { %s1524_s29 = smov %s1521_s17 }
 0x355   :  { %866 = vsyncpa [#allocation3], 1 }
 0x356   :  { %868 = vsyncpa [#allocation3 + $0x1], 1 }
 0x357   :  { %869 = vsyncpa [#allocation4], 1 }
 0x358   :  { %871 = vsyncpa [#allocation4 + $0x1], 1 }

</bundles_post_ra>
